<compile_context>
chip_gen: v7x
topology: tpu7x:2x2x1
jax: 0.10.0
libtpu: 0.0.40
codegen_flags: <defaults>
</compile_context>

<pallas_src>
import numpy as np
import jax
import jax.numpy as jnp
from jax.experimental import pallas as pl
from jax.experimental.pallas import tpu as pltpu


def adjust_indices(indices, arr_size1, arr_size2):
    """NumPy port of the PyTorch adjust_indices (used only as a reference/sanity check)."""
    ind = np.asarray(indices)
    rows, cols = [], []
    for e in range(ind.shape[1]):
        t0, t1 = int(ind[0, e]), int(ind[1, e])
        for i in range(arr_size1):
            for j in range(arr_size2):
                rows.append(t0 * arr_size2 + j)
                cols.append(t1 * arr_size1 + i)
    return np.stack([np.array(rows, np.int32), np.array(cols, np.int32)], axis=0)


def _round_up(v, m):
    return ((v + m - 1) // m) * m


# ---------------------------------------------------------------------------
# Pallas kernel: one (tm, tn) output tile of  y = x @ W^T + b
# ---------------------------------------------------------------------------
def _matmul_bias_kernel(x_ref, wT_ref, b_ref, o_ref, acc_ref):
    # x_ref: (tm, tk) bf16/f32, wT_ref: (tk, tn), b_ref: (1, tn) f32, o_ref: (tm, tn) f32
    @pl.when(pl.program_id(2) == 0)
    def _():
        acc_ref[...] = jnp.zeros_like(acc_ref)

    acc_ref[...] += jnp.dot(x_ref[...], wT_ref[...], preferred_element_type=jnp.float32)

    @pl.when(pl.program_id(2) == pl.num_programs(2) - 1)
    def _():
        o_ref[...] = (acc_ref[...] + b_ref[...]).astype(o_ref.dtype)


def _pallas_linear(x2d, wT, bias, *, use_bf16=True):
    """(B, size1) @ (size1, size2) + bias[None, :] via a tiled Pallas matmul.

    Pads M to sublane multiples, K/N to lane multiples, slices the result back.
    """
    B, K = x2d.shape
    K2, N = wT.shape
    assert K == K2
    out_dtype = jnp.float32

    # Tile sizes: batch pads only to 8 sublanes; K/N lane-aligned (256/512 multiples feed the
    # 256-wide MXU on v6e/v7x; still 128-divisible for v5e).
    tm = min(_round_up(B, 8), 128)
    tk = min(_round_up(K, 128), 512)
    tn = min(_round_up(N, 128), 256)
    Mp, Kp, Np = _round_up(B, tm), _round_up(K, tk), _round_up(N, tn)

    in_dtype = jnp.bfloat16 if use_bf16 else jnp.float32
    xp = jnp.pad(x2d.astype(in_dtype), ((0, Mp - B), (0, Kp - K)))
    wp = jnp.pad(wT.astype(in_dtype), ((0, Kp - K), (0, Np - N)))
    bp = jnp.pad(bias.astype(jnp.float32).reshape(1, N), ((0, 0), (0, Np - N)))

    grid = (Mp // tm, Np // tn, Kp // tk)

    item = jnp.dtype(in_dtype).itemsize
    out_item = jnp.dtype(out_dtype).itemsize
    # Double-buffered x / W / out tiles + bias + f32 accumulator, with 2x headroom.
    vmem_need = (2 * (tm * tk + tk * tn) * item
                 + 2 * tn * 4
                 + 2 * tm * tn * out_item
                 + tm * tn * 4)
    vmem_limit = int(min(max(2 * vmem_need, 16 << 20), 64 << 20))

    cost = pl.CostEstimate(
        flops=2 * Mp * Kp * Np,
        transcendentals=0,
        bytes_accessed=xp.size * item + wp.size * item + bp.size * 4 + Mp * Np * out_item,
    )

    yp = pl.pallas_call(
        _matmul_bias_kernel,
        out_shape=jax.ShapeDtypeStruct((Mp, Np), out_dtype),
        grid_spec=pltpu.PrefetchScalarGridSpec(
            num_scalar_prefetch=0,
            grid=grid,
            in_specs=[
                pl.BlockSpec((tm, tk), lambda m, n, k: (m, k)),   # x tile
                pl.BlockSpec((tk, tn), lambda m, n, k: (k, n)),   # W^T tile (K-tiled; never fully resident)
                pl.BlockSpec((1, tn), lambda m, n, k: (0, n)),    # bias row (lane-dense)
            ],
            out_specs=pl.BlockSpec((tm, tn), lambda m, n, k: (m, n)),
            scratch_shapes=[pltpu.VMEM((tm, tn), jnp.float32)],
        ),
        compiler_params=pltpu.CompilerParams(
            dimension_semantics=("parallel", "parallel", "arbitrary"),
            vmem_limit_bytes=vmem_limit),
        cost_estimate=cost,
    )(xp, wp, bp)
    return yp[:B, :N]


# ---------------------------------------------------------------------------
# Block-structured W^T assembly (no per-element scatter)
# ---------------------------------------------------------------------------
def build_wT_from_blocks(values, edge_t0, edge_t1, graph_size, arr_size1, arr_size2):
    """W^T (size1, size2) from E dense (arr_size1, arr_size2) edge blocks.

    values[e, i, j] goes to W[t0*a2 + j, t1*a1 + i]  ==  W^T[t1*a1 + i, t0*a2 + j];
    duplicate edges are summed (same as torch_sparse.spmm coalescing).
    """
    E = edge_t0.shape[0]
    blocks = values.reshape(E, arr_size1, arr_size2)
    block_ids = edge_t1 * graph_size + edge_t0            # (row-block, col-block) of W^T
    summed = jax.ops.segment_sum(blocks, block_ids, num_segments=graph_size * graph_size)
    wT = (summed.reshape(graph_size, graph_size, arr_size1, arr_size2)
                .transpose(0, 2, 1, 3)
                .reshape(graph_size * arr_size1, graph_size * arr_size2))
    return wT
    # TODO(synk): for very large graphs, assemble W^T tiles directly in VMEM scratch inside the
    #             kernel using PrefetchScalarGridSpec per-tile edge lists instead of this
    #             segment-sum densification.


# ---------------------------------------------------------------------------
# Forward
# ---------------------------------------------------------------------------
def bayesian_sparse_linear_forward(key, weight_mean, weight_log_var, b_mean, b_log_var,
                                   edge_t0, edge_t1, graph_size, arr_size1, arr_size2,
                                   x, alpha=1.0, use_pallas=None, use_bf16=True):
    """Returns (y, alpha*kl, wT, b, values).  kl is hard-zeroed exactly like the module."""
    size1 = graph_size * arr_size1
    size2 = graph_size * arr_size2

    k_w, k_b = jax.random.split(key)
    # Reparameterized samples (torch.randn_like * exp(log_var) + mean).
    values = (jax.random.normal(k_w, weight_mean.shape, weight_mean.dtype)
              * jnp.exp(weight_log_var) + weight_mean)
    b = (jax.random.normal(k_b, b_mean.shape, b_mean.dtype)
         * jnp.exp(b_log_var) + b_mean)
    # TODO(synk): optionally fuse sampling into the kernel with pltpu.prng_seed/prng_random_bits
    #             (changes the RNG stream vs jax.random, so kept in the wrapper here).

    wT = build_wT_from_blocks(values, edge_t0, edge_t1, graph_size, arr_size1, arr_size2)

    B = x.shape[0]
    x2d = x[..., 0]                                        # (B, size1), no transpose needed

    if use_pallas is None:
        # Tiny problems: XLA's fused dot beats the pallas_call fixed cost.
        use_pallas = (B * size1 * size2) >= (1 << 22)

    if use_pallas:
        y2d = _pallas_linear(x2d, wT, b, use_bf16=use_bf16)
    else:
        y2d = jnp.dot(x2d.astype(jnp.float32), wT.astype(jnp.float32),
                      preferred_element_type=jnp.float32) + b[None, :]

    y = y2d.reshape(B, size2, 1)

    # Module computes a KL term and then overwrites it with 0 before returning.
    kl = 0.0
    return y, alpha * kl, wT, b, values


if __name__ == "__main__":
    # --- deterministic module construction (synthetic init, no checkpoints) ---
    arr_size1 = 16
    arr_size2 = 16
    # 8-node graph, 11 edges; edge (0,1) is duplicated to exercise coalescing/summation.
    indices = np.array([[0, 1, 2, 3, 4, 5, 6, 7, 0, 3, 0],
                        [1, 2, 3, 4, 5, 6, 7, 0, 5, 6, 1]], dtype=np.int32)
    graph_size = int(indices.max()) + 1                    # 8
    size1 = graph_size * arr_size1                         # 128
    size2 = graph_size * arr_size2                         # 128
    E = indices.shape[1]
    nnz = E * arr_size1 * arr_size2                        # 2816

    key = jax.random.PRNGKey(0)
    k_wm, k_bm, k_x, k_fwd = jax.random.split(key, 4)
    # weight_mean, b_mean ~ U(-1/len(indices), 1/len(indices)) with len(indices)==2 -> U(-0.5, 0.5)
    weight_mean = jax.random.uniform(k_wm, (nnz,), jnp.float32, minval=-0.5, maxval=0.5)
    weight_log_var = jnp.zeros((nnz,), jnp.float32)
    b_mean = jax.random.uniform(k_bm, (size2,), jnp.float32, minval=-0.5, maxval=0.5)
    b_log_var = jnp.zeros((size2,), jnp.float32)
    alpha = 1.0

    # input: (B, size1, 1) — spmm acts on dim -2 (matches bias reshape in the module)
    B = 2
    x = jax.random.normal(k_x, (B, size1, 1), dtype=jnp.float32)

    edge_t0 = jnp.asarray(indices[0], jnp.int32)
    edge_t1 = jnp.asarray(indices[1], jnp.int32)

    # --- run forward (force the Pallas path so the kernel is exercised at this small size) ---
    y, kl, wT, b_sample, values = bayesian_sparse_linear_forward(
        k_fwd, weight_mean, weight_log_var, b_mean, b_log_var,
        edge_t0, edge_t1, graph_size, arr_size1, arr_size2, x,
        alpha=alpha, use_pallas=True, use_bf16=True)
    y = jax.block_until_ready(y)

    # --- reference #1: block-structured W build vs element-wise scatter of adjust_indices ---
    adj = adjust_indices(indices, arr_size1, arr_size2)
    w_scatter = np.zeros((size2, size1), np.float32)
    np.add.at(w_scatter, (adj[0], adj[1]), np.asarray(values))
    np.testing.assert_allclose(np.asarray(wT).T, w_scatter, rtol=1e-6, atol=1e-6)

    # --- reference #2: kernel output vs pure-JAX dense reference on the same bf16 operands ---
    wT_bf = wT.astype(jnp.bfloat16).astype(jnp.float32)
    x_bf = x[..., 0].astype(jnp.bfloat16).astype(jnp.float32)
    y_ref = (jnp.dot(x_bf, wT_bf, preferred_element_type=jnp.float32)
             + b_sample[None, :]).reshape(B, size2, 1)
    np.testing.assert_allclose(np.asarray(y), np.asarray(y_ref), rtol=1e-4, atol=1e-4)
    assert float(kl) == 0.0

    print("KERNEL_OK")
</pallas_src>

<mosaic_0001>
module attributes {stable_mosaic.version = 11 : i64} {
  func.func @_matmul_bias_kernel(%arg0: i32, %arg1: i32, %arg2: i32, %arg3: memref<8x128xbf16, #tpu.memory_space<vmem>>, %arg4: memref<128x128xbf16, #tpu.memory_space<vmem>>, %arg5: memref<1x128xf32, #tpu.memory_space<vmem>>, %arg6: memref<8x128xf32, #tpu.memory_space<vmem>>, %arg7: memref<8x128xf32, #tpu.memory_space<vmem>>) attributes {dimension_semantics = [#tpu.dimension_semantics<parallel>, #tpu.dimension_semantics<parallel>, #tpu.dimension_semantics<arbitrary>], iteration_bounds = array<i64: 1, 1, 1>, scalar_prefetch = 0 : i64, scratch_operands = 1 : i64, tpu.core_type = #tpu.core_type<tc>, window_params = [{transform_indices = @transform_0, window_bounds = array<i64: 8, 128>}, {transform_indices = @transform_1, window_bounds = array<i64: 128, 128>}, {transform_indices = @transform_2, window_bounds = array<i64: 1, 128>}, {transform_indices = @transform_3, window_bounds = array<i64: 8, 128>}]} {
    %c0_i32 = arith.constant 0 : i32
    %0 = arith.cmpi eq, %arg2, %c0_i32 : i32
    %1 = arith.extui %0 : i1 to i32
    %c0_i32_0 = arith.constant 0 : i32
    %2 = arith.cmpi ne, %1, %c0_i32_0 : i32
    scf.if %2 {
      %cst_10 = arith.constant 0.000000e+00 : f32
      %12 = vector.broadcast %cst_10 : f32 to vector<8x128xf32>
      %c0_11 = arith.constant 0 : index
      %c0_12 = arith.constant 0 : index
      %13 = vector.load %arg7[%c0_11, %c0_12] : memref<8x128xf32, #tpu.memory_space<vmem>>, vector<8x128xf32>
      tpu.vector_store %arg7[%c0_11, %c0_12], %12 {strides = array<i32>} : memref<8x128xf32, #tpu.memory_space<vmem>>, vector<8x128xf32>,
    } else {
    }
    %c0 = arith.constant 0 : index
    %c0_1 = arith.constant 0 : index
    %3 = vector.load %arg7[%c0, %c0_1] : memref<8x128xf32, #tpu.memory_space<vmem>>, vector<8x128xf32>
    %c0_2 = arith.constant 0 : index
    %c0_3 = arith.constant 0 : index
    %4 = vector.load %arg3[%c0_2, %c0_3] : memref<8x128xbf16, #tpu.memory_space<vmem>>, vector<8x128xbf16>
    %c0_4 = arith.constant 0 : index
    %c0_5 = arith.constant 0 : index
    %5 = vector.load %arg4[%c0_4, %c0_5] : memref<128x128xbf16, #tpu.memory_space<vmem>>, vector<128x128xbf16>
    %cst = arith.constant dense<0.000000e+00> : vector<8x128xf32>
    %6 = tpu.matmul %4, %5, %cst {dimension_numbers = #tpu.dot_dimension_numbers<[1], [0], [0], [1], [0, 0, 1, 1], [], []>} : vector<8x128xbf16>, vector<128x128xbf16>, vector<8x128xf32> -> vector<8x128xf32>
    %7 = arith.addf %3, %6 : vector<8x128xf32>
    %c0_6 = arith.constant 0 : index
    %c0_7 = arith.constant 0 : index
    %8 = vector.load %arg7[%c0_6, %c0_7] : memref<8x128xf32, #tpu.memory_space<vmem>>, vector<8x128xf32>
    tpu.vector_store %arg7[%c0_6, %c0_7], %7 {strides = array<i32>} : memref<8x128xf32, #tpu.memory_space<vmem>>, vector<8x128xf32>,
    %c0_i32_8 = arith.constant 0 : i32
    %9 = arith.cmpi eq, %arg2, %c0_i32_8 : i32
    %10 = arith.extui %9 : i1 to i32
    %c0_i32_9 = arith.constant 0 : i32
    %11 = arith.cmpi ne, %10, %c0_i32_9 : i32
    scf.if %11 {
      %c0_10 = arith.constant 0 : index
      %c0_11 = arith.constant 0 : index
      %12 = vector.load %arg7[%c0_10, %c0_11] : memref<8x128xf32, #tpu.memory_space<vmem>>, vector<8x128xf32>
      %c0_12 = arith.constant 0 : index
      %c0_13 = arith.constant 0 : index
      %13 = vector.load %arg5[%c0_12, %c0_13] : memref<1x128xf32, #tpu.memory_space<vmem>>, vector<1x128xf32>
      %14 = vector.broadcast %13 : vector<1x128xf32> to vector<8x128xf32>
      %15 = arith.addf %12, %14 : vector<8x128xf32>
      %c0_14 = arith.constant 0 : index
      %c0_15 = arith.constant 0 : index
      %16 = vector.load %arg6[%c0_14, %c0_15] : memref<8x128xf32, #tpu.memory_space<vmem>>, vector<8x128xf32>
      tpu.vector_store %arg6[%c0_14, %c0_15], %15 {strides = array<i32>} : memref<8x128xf32, #tpu.memory_space<vmem>>, vector<8x128xf32>,
    } else {
    }
    return
  }
  func.func @transform_0(%arg0: i32, %arg1: i32, %arg2: i32) -> (i32, i32) {
    %c0_i32 = arith.constant 0 : i32
    return %arg0, %arg2 : i32, i32
  }
  func.func @transform_1(%arg0: i32, %arg1: i32, %arg2: i32) -> (i32, i32) {
    %c0_i32 = arith.constant 0 : i32
    return %arg2, %arg1 : i32, i32
  }
  func.func @transform_2(%arg0: i32, %arg1: i32, %arg2: i32) -> (i32, i32) {
    %c0_i32 = arith.constant 0 : i32
    %c0_i32_0 = arith.constant 0 : i32
    return %c0_i32, %arg1 : i32, i32
  }
  func.func @transform_3(%arg0: i32, %arg1: i32, %arg2: i32) -> (i32, i32) {
    %c0_i32 = arith.constant 0 : i32
    return %arg0, %arg1 : i32, i32
  }
}

</mosaic_0001>

<bundles_post_ra>
// kernel: tpu_custom_call.1
= control target key start
LH: loop header
LB: loop body
LE: loop exit
PB: predicated region body
PF: predicated region fallthrough
CT: control target
= control target key end

     0   :  { %8 = vsyncpa [#allocation4], 0  ;;  %s382_s0 = inlined_call_operand.hbm [shape: bf16[8,128], index: 0, kind: input, shape index: {}]   ;;  %s383_s1 = inlined_call_operand.hbm [shape: bf16[128,128], index: 1, kind: input, shape index: {}]   ;;  %s384_s2 = inlined_call_operand.vmem [shape: f32[1,128], index: 2, kind: input, shape index: {}]   ;;  %s385_s3 = inlined_call_operand.hbm [shape: f32[8,128], index: 3, kind: output, shape index: {}]  }
   0x1   :  { %9 = vsyncpa [#allocation7], 0 }
   0x2   :  { %10 = vsyncpa [#allocation5], 0  ;;  %s309_s12 = smov [#allocation3]   ;;  %s310_s14 = smov [#allocation6]  }
   0x3   :  { %s17_s13 = sshll.u32 %s309_s12, 4  ;;  %s26_s15 = sshll.u32 %s310_s14, 4  ;;  %s18_s13 = int_to_ptr.vmem [resolvable:$true] %s17_s13  ;;  %s336_s15 = int_to_ptr.vmem [resolvable:$true] %s26_s15 }
   0x4   :  { %s237_s18 = scalar_lea.hbm %s382_s0, 64 }
   0x5   :  { %p238_p0 = scmp.ne.s32.totalorder %s382_s0, %s237_s18  ;;  %p241_p1 = scmp.lt.u32.totalorder %s237_s18, %s382_s0 }
   0x7   :  { %p243_p2 = pnand %p241_p1, %p238_p0 }
   0x9   :  { %246 = shalt.err (!%p243_p2)
}
   0xa   :  { %s247_s23 = scalar_lea.vmem %s18_s13, 64  ;;  %p252_p4 = scmp.lt.s32.totalorder %s18_s13, %s18_s13 }
   0xb   :  { %p248_p3 = scmp.ne.s32.totalorder %s18_s13, %s247_s23  ;;  %p253_p5 = scmp.lt.s32.totalorder %s247_s23, %s247_s23 }
   0xd   :  { %p254_p6 = por %p253_p5, %p252_p4 }
   0xf   :  { %p255_p7 = pnand %p254_p6, %p248_p3 }
  0x11   :  { %258 = shalt.err (!%p255_p7)
}
  0x12   :  { %20 = dma.hbm_to_vmem [thread:$0]  %s382_s0, 64, %s18_s13, [#allocation4]  }
  0x13   :  { %s259_s28 = scalar_lea.hbm %s383_s1, 1024 }
  0x14   :  { %p260_p8 = scmp.ne.s32.totalorder %s383_s1, %s259_s28  ;;  %p263_p9 = scmp.lt.u32.totalorder %s259_s28, %s383_s1 }
  0x16   :  { %p265_p10 = pnand %p263_p9, %p260_p8 }
  0x18   :  { %268 = shalt.err (!%p265_p10)
}
  0x19   :  { %s269_s6 = scalar_lea.vmem %s336_s15, 1024  ;;  %p274_p12 = scmp.lt.s32.totalorder %s336_s15, %s336_s15 }
  0x1a   :  { %p270_p11 = scmp.ne.s32.totalorder %s336_s15, %s269_s6  ;;  %p275_p13 = scmp.lt.s32.totalorder %s269_s6, %s269_s6 }
  0x1c   :  { %p276_p0 = por %p275_p13, %p274_p12 }
  0x1e   :  { %p277_p1 = pnand %p276_p0, %p270_p11 }
  0x20   :  { %280 = shalt.err (!%p277_p1)
}
  0x21   :  { %s311_s0 = smov 64   ;;  %s312_s7 = smov 4  }
  0x22   :  { %32 = dma.hbm_to_vmem [thread:$0]  %s383_s1, 1024, %s336_s15, [#allocation7], %s311_s0, %s311_s0, %s312_s7  }
  0x23   :  { %303 = dma.done.wait [#allocation4], 64  }
  0x24   :  { %304 = vsyncadd [#allocation4], 4294967232 }
  0x25   :  { %305 = dma.done.wait [#allocation7], 1024  }
  0x26   :  { %306 = vsyncadd [#allocation7], 4294966272  ;;  %v313_v0 = vmov 0.0   ;;  %vm314_vm0 = vmmov 0   ;;  %v229_v1 = vld [vmem:[#allocation6] sm:$0xff]   ;;  %v230_v2 = vld [vmem:[#allocation6 + $0x8] sm:$0xff]  }
  0x27   :  { %202 = vmatprep.subr.bf16.mxu0 %v313_v0  ;;  %218 = vmatprep.mubr.msk.bf16.mxu0 %vm314_vm0, %v313_v0  ;;  %v231_v3 = vld [vmem:[#allocation6 + $0x10] sm:$0xff]   ;;  %v232_v4 = vld [vmem:[#allocation6 + $0x18] sm:$0xff]   ;;  %v233_v5 = vld [vmem:[#allocation6 + $0x20] sm:$0xff]   ;;  %s315_s11 = smov [#allocation8]  }
  0x28   :  { %203 = vmatpush3.bf16.msra.mxu0 %v229_v1  ;;  %v234_v6 = vld [vmem:[#allocation6 + $0x28] sm:$0xff]   ;;  %v235_v7 = vld [vmem:[#allocation6 + $0x30] sm:$0xff]   ;;  %v236_v8 = vld [vmem:[#allocation6 + $0x38] sm:$0xff]   ;;  %s174_s12 = sshll.u32 %s315_s11, 4  ;;  %s175_s12 = int_to_ptr.vmem [resolvable:$true] %s174_s12 }
  0x29   :  { %204 = vmatprep.subr.bf16.mxu0 %v313_v0  ;;  %v48_v9 = vld [vmem:[#allocation3] sm:$0xf]  ;;  %s281_s13 = scalar_lea.vmem %s175_s12, 128  ;;  %p286_p3 = scmp.lt.s32.totalorder %s175_s12, %s175_s12 }
  0x2a   :  { %v192_v10 = vld [vmem:[%s384_s2] ss:$0 sm:$0xff]  ;;  %p282_p2 = scmp.ne.s32.totalorder %s175_s12, %s281_s13  ;;  %p287_p4 = scmp.lt.s32.totalorder %s281_s13, %s281_s13 }
  0x2c   :  { %205 = vmatpush3.bf16.msra.mxu0 %v230_v2  ;;  %p288_p5 = por %p287_p4, %p286_p3 }
  0x2d   :  { %206 = vmatprep.subr.bf16.mxu0 %v313_v0 }
  0x2e   :  { %p289_p6 = pnand %p288_p5, %p282_p2 }
  0x30   :  { %207 = vmatpush3.bf16.msra.mxu0 %v231_v3 }
  0x31   :  { %208 = vmatprep.subr.bf16.mxu0 %v313_v0 }
  0x34   :  { %209 = vmatpush3.bf16.msra.mxu0 %v232_v4 }
  0x35   :  { %210 = vmatprep.subr.bf16.mxu0 %v313_v0 }
  0x38   :  { %211 = vmatpush3.bf16.msra.mxu0 %v233_v5 }
  0x39   :  { %212 = vmatprep.subr.bf16.mxu0 %v313_v0 }
  0x3c   :  { %213 = vmatpush3.bf16.msra.mxu0 %v234_v6 }
  0x3d   :  { %214 = vmatprep.subr.bf16.mxu0 %v313_v0 }
  0x40   :  { %215 = vmatpush3.bf16.msra.mxu0 %v235_v7 }
  0x41   :  { %216 = vmatprep.subr.bf16.mxu0 %v313_v0 }
  0x44   :  { %217 = vmatpush3.bf16.msra.mxu0 %v236_v8 }
  0x47   :  { %219 = vmatmul.mubr.bf16.vlgmr.msra.gmra.mrb[0].mxu0 %v48_v9 }
 0x11a   :  { %v147_v11 = vpop.f32.mrb[0].mxu0 }
 0x11b   :  { %v166_v12 = vadd.f32 %v192_v10, %v147_v11  ;;  %v220_v13 = vpop.f32.mrb[1].mxu0 }
 0x11c   :  { %v150_v14 = vpop.f32.mrb[2].mxu0 }
 0x11d   :  { %167 = vst [vmem:[#allocation8] sm:$0xff] %v166_v12  ;;  %v221_v15 = vpop.f32.mrb[3].mxu0 }
 0x11e   :  { %292 = shalt.err (!%p289_p6)
}
 0x11f   :  { %s293_s2 = scalar_lea.hbm %s385_s3, 128 }
 0x120   :  { %p294_p7 = scmp.ne.s32.totalorder %s385_s3, %s293_s2  ;;  %p297_p8 = scmp.lt.u32.totalorder %s293_s2, %s385_s3 }
 0x122   :  { %p299_p9 = pnand %p297_p8, %p294_p7 }
 0x124   :  { %302 = shalt.err (!%p299_p9)
}
 0x125   :  { %177 = dma.vmem_to_hbm [thread:$0]  %s175_s12, 128, %s385_s3, [#allocation5]  }
 0x126   :  { %307 = dma.done.wait [#allocation5], 128  }
 0x127   :  { %308 = vsyncadd [#allocation5], 4294967168 }
 0x128   :  { %181 = vsyncpa [#allocation4], 1 }
 0x129   :  { %182 = vsyncpa [#allocation7], 1 }
 0x12a   :  { %183 = vsyncpa [#allocation5], 1 }

</bundles_post_ra>
